<compile_context>
chip_gen: v5e
topology: v5e:2x2
jax: 0.10.0
libtpu: 0.0.40
codegen_flags: <defaults>
</compile_context>

<pallas_src>
import functools

import jax
import jax.numpy as jnp
from jax.experimental import pallas as pl
from jax.experimental.pallas import tpu as pltpu


def _round_up(v, m):
    return ((v + m - 1) // m) * m


def _vmem_cap_bytes():
    # Generation-aware scoped-VMEM cap: ~64 MiB physical on v7x -> stay <= 40 MiB;
    # 128 MiB physical on v5e/v6e -> allow up to ~56 MiB.
    try:
        phys = getattr(pltpu.get_tpu_info(), "vmem_capacity_bytes", 128 << 20)
    except Exception:
        phys = 128 << 20
    return (56 << 20) if phys >= (96 << 20) else (40 << 20)


# ---------------------------------------------------------------------------
# Stage 1: streamed one-hot segment-sum (scatter_mean numerator) on the MXU.
# Grid = (n_splits, tiles_per_split); the leading "parallel" axis lets v7x's
# two TensorCores each own one partial accumulator slab.
# ---------------------------------------------------------------------------
def _pool_kernel(batch_ref, x_ref, out_ref, *, n_nodes, tile_n, tiles_per_split,
                 need_row_mask):
    c = pl.program_id(0)
    t = pl.program_id(1)

    @pl.when(t == 0)
    def _():
        out_ref[...] = jnp.zeros_like(out_ref)

    x = x_ref[...]                                          # (tile_n, hidden)
    if need_row_mask:
        # Ragged last tile / overshoot duplicate tiles: rows past the real node
        # count may contain garbage (possibly NaN/Inf); zero them so NaN*0 can
        # never corrupt the accumulator via the matmul.
        row_start = (c * tiles_per_split + t) * tile_n
        row_ids = jax.lax.broadcasted_iota(jnp.int32, (tile_n, 1), 0) + row_start
        x = jnp.where(row_ids < n_nodes, x, 0)

    b_pad = out_ref.shape[0]
    batch = batch_ref[...]                                  # (1, tile_n) int32
    graph_ids = jax.lax.broadcasted_iota(jnp.int32, (b_pad, tile_n), 0)
    onehot = (batch == graph_ids).astype(x.dtype)           # (b_pad, tile_n)

    out_ref[...] += jnp.dot(onehot, x, preferred_element_type=jnp.float32)


# ---------------------------------------------------------------------------
# Stage 2: combine per-split partial sums, apply exact mean, then
# Linear -> BatchNorm1d (training-mode batch stats) -> ReLU -> Linear.
# ---------------------------------------------------------------------------
def _finalize_kernel(psum_ref, invc_ref, w1_ref, b1_ref, gamma_ref, beta_ref,
                     w2_ref, b2_ref, out_ref, *, num_graphs):
    pooled = jnp.sum(psum_ref[...], axis=0) * invc_ref[...]   # (b_pad, hidden)

    h = jnp.dot(pooled, w1_ref[...],
                preferred_element_type=jnp.float32) + b1_ref[...]

    # BatchNorm1d with batch statistics (biased variance) over the real
    # num_graphs rows only; padded accumulator rows are masked out.
    b_pad = h.shape[0]
    row_mask = jax.lax.broadcasted_iota(jnp.int32, (b_pad, 1), 0) < num_graphs
    inv_b = 1.0 / float(num_graphs)
    mu = jnp.sum(jnp.where(row_mask, h, 0.0), axis=0, keepdims=True) * inv_b
    d = jnp.where(row_mask, h - mu, 0.0)
    var = jnp.sum(d * d, axis=0, keepdims=True) * inv_b
    scale = jax.lax.rsqrt(var + 1e-5) * gamma_ref[...]
    hn = (h - mu) * scale + beta_ref[...]

    hn = jnp.maximum(hn, 0.0)                                  # ReLU

    res = jnp.dot(hn, w2_ref[...],
                  preferred_element_type=jnp.float32) + b2_ref[...]
    out_ref[...] = res[:num_graphs, :]


def global_model_forward(x, edge_index, edge_attr, u, batch, params, num_graphs,
                         *, tile_n=None, n_splits=None):
    """Pallas implementation of GlobalModel.forward.

    x:     [N, hidden] node features, streamed in their native dtype
    batch: [N] int32 graph assignment (values in [0, num_graphs))
    edge_index, edge_attr, u are unused by GlobalModel.forward (kept for parity).
    """
    del edge_index, edge_attr, u
    n_nodes, hidden = x.shape
    outputs = params["w2"].shape[1]
    itemsize = jnp.dtype(x.dtype).itemsize

    b_pad = _round_up(max(num_graphs, 1), 8)       # sublane-aligned accumulator

    # ---- node-axis tile sizing: ~4 MiB of x per pipeline buffer, bounded by
    # the (b_pad, tile_n) one-hot intermediate, multiple of 128 lanes. ----
    if tile_n is None:
        tn = max(128, ((4 << 20) // max(hidden * itemsize, 1)) // 128 * 128)
        onehot_cap = max(128, ((8 << 20) // max(b_pad * 8, 1)) // 128 * 128)
        tn = min(tn, onehot_cap)
        tile_n = n_nodes if tn >= n_nodes else tn   # small N: one full block
    n_tiles = pl.cdiv(n_nodes, tile_n)

    # Leading "parallel" axis: 2 slabs so v7x's two TensorCores split the node
    # stream; on 1-TC chips the slabs run sequentially (same total work).
    if n_splits is None:
        n_splits = min(2, n_tiles)
    tiles_per_split = pl.cdiv(n_tiles, n_splits)
    exact = (n_splits * tiles_per_split == n_tiles)
    need_row_mask = (tile_n * n_tiles != n_nodes) or (not exact)

    if exact:
        tile_idx = lambda c, t: c * tiles_per_split + t
    else:
        # Clamp overshoot tiles to the last real block; the kernel's row mask
        # (nominal offset >= N) guarantees they contribute nothing.
        tile_idx = lambda c, t: jnp.minimum(c * tiles_per_split + t, n_tiles - 1)

    batch2d = batch.astype(jnp.int32).reshape(1, n_nodes)

    # Exact per-graph inverse counts, hoisted out of the per-tile loop (the
    # scatter-add only touches the tiny [N] int32 batch vector).
    counts = jnp.zeros((b_pad,), jnp.float32).at[batch.astype(jnp.int32)].add(1.0)
    inv_counts = jnp.where(counts > 0.0, 1.0 / jnp.maximum(counts, 1.0),
                           0.0).reshape(b_pad, 1)

    cap = _vmem_cap_bytes()

    # ---- stage 1: streamed segment-sum ----
    x_tile_b = tile_n * hidden * itemsize
    interm_b = (b_pad * tile_n * 9            # iota + compare + one-hot
                + tile_n * hidden * 4         # masked x copy
                + tile_n * 8)                 # row iota / batch temporaries
    vmem1 = int(min(cap, max(32 << 20,
                             2 * (x_tile_b + tile_n * 4)
                             + 2 * n_splits * b_pad * hidden * 4
                             + interm_b + (4 << 20))))

    partial_sums = pl.pallas_call(
        functools.partial(_pool_kernel, n_nodes=n_nodes, tile_n=tile_n,
                          tiles_per_split=tiles_per_split,
                          need_row_mask=need_row_mask),
        out_shape=jax.ShapeDtypeStruct((n_splits, b_pad, hidden), jnp.float32),
        grid_spec=pltpu.PrefetchScalarGridSpec(
            num_scalar_prefetch=0,
            grid=(n_splits, tiles_per_split),
            in_specs=[
                pl.BlockSpec((1, tile_n), lambda c, t: (0, tile_idx(c, t))),
                pl.BlockSpec((tile_n, hidden), lambda c, t: (tile_idx(c, t), 0)),
            ],
            out_specs=pl.BlockSpec((None, b_pad, hidden), lambda c, t: (c, 0, 0)),
        ),
        compiler_params=pltpu.CompilerParams(
            dimension_semantics=("parallel", "arbitrary"),
            vmem_limit_bytes=vmem1),
    )(batch2d, x)

    # ---- stage 2: combine + mean + Linear -> BN -> ReLU -> Linear ----
    param_b = (hidden * hidden + 3 * hidden + hidden * outputs + outputs) * 4
    vmem2 = int(min(cap, max(16 << 20,
                             2 * (n_splits * b_pad * hidden * 4 + b_pad * 4
                                  + param_b)
                             + 6 * b_pad * hidden * 4 + (2 << 20))))

    full = lambda shape: pl.BlockSpec(shape, lambda i, _n=len(shape): (0,) * _n)

    return pl.pallas_call(
        functools.partial(_finalize_kernel, num_graphs=num_graphs),
        out_shape=jax.ShapeDtypeStruct((num_graphs, outputs), jnp.float32),
        grid_spec=pltpu.PrefetchScalarGridSpec(
            num_scalar_prefetch=0,
            grid=(1,),
            in_specs=[
                full((n_splits, b_pad, hidden)),   # partial pooled sums
                full((b_pad, 1)),                  # exact 1/count
                full((hidden, hidden)),            # W1 (in, out)
                full((1, hidden)),                 # b1
                full((1, hidden)),                 # gamma
                full((1, hidden)),                 # beta
                full((hidden, outputs)),           # W2 (in, out)
                full((1, outputs)),                # b2
            ],
            out_specs=full((num_graphs, outputs)),
        ),
        compiler_params=pltpu.CompilerParams(
            dimension_semantics=("arbitrary",),
            vmem_limit_bytes=vmem2),
    )(partial_sums, inv_counts, params["w1"], params["b1"], params["gamma"],
      params["beta"], params["w2"], params["b2"])


def init_params(key, hidden, outputs):
    k1, k2, k3, k4 = jax.random.split(key, 4)
    # Deterministic synthetic init; weights stored as [in, out] (PyTorch W.T).
    return {
        "w1": jax.random.normal(k1, (hidden, hidden), jnp.float32) * 0.1,
        "b1": jax.random.normal(k2, (1, hidden), jnp.float32) * 0.01,
        "gamma": jnp.ones((1, hidden), jnp.float32),
        "beta": jnp.zeros((1, hidden), jnp.float32),
        "w2": jax.random.normal(k3, (hidden, outputs), jnp.float32) * 0.1,
        "b2": jax.random.normal(k4, (1, outputs), jnp.float32) * 0.01,
    }


def _reference(x, batch, params, num_graphs):
    onehot = (batch[None, :] == jnp.arange(num_graphs)[:, None]).astype(jnp.float32)
    counts = onehot.sum(1, keepdims=True)
    pooled = (onehot @ x) / jnp.maximum(counts, 1.0)
    h = pooled @ params["w1"] + params["b1"]
    mu = h.mean(0, keepdims=True)
    var = ((h - mu) ** 2).mean(0, keepdims=True)
    hn = (h - mu) / jnp.sqrt(var + 1e-5) * params["gamma"] + params["beta"]
    return jnp.maximum(hn, 0.0) @ params["w2"] + params["b2"]


if __name__ == "__main__":
    key = jax.random.PRNGKey(0)
    kx, kp, kx2 = jax.random.split(key, 3)

    hidden, outputs = 32, 8
    params = init_params(kp, hidden, outputs)

    # --- small case: 16 nodes, 2 graphs (single block, single split) ---
    n_nodes, num_graphs = 16, 2
    x = jax.random.normal(kx, (n_nodes, hidden), jnp.float32)
    batch = jnp.concatenate([jnp.zeros(8, jnp.int32), jnp.ones(8, jnp.int32)])
    edge_index = jnp.zeros((2, 1), jnp.int32)    # unused by forward
    edge_attr = jnp.zeros((1, 1), jnp.float32)   # unused by forward
    u = jnp.zeros((num_graphs, 1), jnp.float32)  # unused by forward

    out = global_model_forward(x, edge_index, edge_attr, u, batch,
                               params, num_graphs)
    jax.block_until_ready(out)
    ref = _reference(x, batch, params, num_graphs)
    assert out.shape == (num_graphs, outputs)
    assert jnp.allclose(out, ref, atol=2e-3, rtol=2e-3), (out, ref)

    # --- ragged / multi-tile / 2-split case (exercises the streaming path) ---
    n_nodes2, num_graphs2 = 300, 3
    x2 = jax.random.normal(kx2, (n_nodes2, hidden), jnp.float32)
    sizes = (120, 100, 80)
    batch2 = jnp.concatenate(
        [jnp.full((s,), g, jnp.int32) for g, s in enumerate(sizes)])
    u2 = jnp.zeros((num_graphs2, 1), jnp.float32)

    out2 = global_model_forward(x2, edge_index, edge_attr, u2, batch2,
                                params, num_graphs2, tile_n=128)
    jax.block_until_ready(out2)
    ref2 = _reference(x2, batch2, params, num_graphs2)
    assert out2.shape == (num_graphs2, outputs)
    assert jnp.allclose(out2, ref2, atol=2e-3, rtol=2e-3), (out2, ref2)

    print("KERNEL_OK")
</pallas_src>

<mosaic_0001>
module attributes {stable_mosaic.version = 11 : i64} {
  func.func @_pool_kernel(%arg0: i32, %arg1: i32, %arg2: memref<1x16xi32, #tpu.memory_space<vmem>>, %arg3: memref<16x32xf32, #tpu.memory_space<vmem>>, %arg4: memref<1x8x32xf32, #tpu.memory_space<vmem>>) attributes {dimension_semantics = [#tpu.dimension_semantics<parallel>, #tpu.dimension_semantics<arbitrary>], iteration_bounds = array<i64: 1, 1>, scalar_prefetch = 0 : i64, scratch_operands = 0 : i64, tpu.core_type = #tpu.core_type<tc>, window_params = [{transform_indices = @transform_0, window_bounds = array<i64: 1, 16>}, {transform_indices = @transform_1, window_bounds = array<i64: 16, 32>}, {transform_indices = @transform_2, window_bounds = array<i64: 1, 8, 32>}]} {
    %c0_i32 = arith.constant 0 : i32
    %0 = arith.cmpi eq, %arg1, %c0_i32 : i32
    %1 = arith.extui %0 : i1 to i32
    %c0_i32_0 = arith.constant 0 : i32
    %2 = arith.cmpi ne, %1, %c0_i32_0 : i32
    scf.if %2 {
      %cst_10 = arith.constant 0.000000e+00 : f32
      %17 = vector.broadcast %cst_10 : f32 to vector<8x32xf32>
      %c0_11 = arith.constant 0 : index
      %c0_12 = arith.constant 0 : index
      %c0_13 = arith.constant 0 : index
      %18 = vector.load %arg4[%c0_11, %c0_12, %c0_13] : memref<1x8x32xf32, #tpu.memory_space<vmem>>, vector<1x8x32xf32>
      %19 = vector.shape_cast %18 : vector<1x8x32xf32> to vector<8x32xf32>
      %20 = vector.shape_cast %17 : vector<8x32xf32> to vector<1x8x32xf32>
      tpu.vector_store %arg4[%c0_11, %c0_12, %c0_13], %20 {strides = array<i32>} : memref<1x8x32xf32, #tpu.memory_space<vmem>>, vector<1x8x32xf32>,
    } else {
    }
    %c0 = arith.constant 0 : index
    %c0_1 = arith.constant 0 : index
    %3 = vector.load %arg3[%c0, %c0_1] : memref<16x32xf32, #tpu.memory_space<vmem>>, vector<16x32xf32>
    %c0_2 = arith.constant 0 : index
    %c0_3 = arith.constant 0 : index
    %4 = vector.load %arg2[%c0_2, %c0_3] : memref<1x16xi32, #tpu.memory_space<vmem>>, vector<1x16xi32>
    %5 = tpu.iota {dimensions = array<i32: 0>} : vector<8x16xi32>
    %6 = vector.broadcast %4 : vector<1x16xi32> to vector<8x16xi32>
    %7 = arith.cmpi eq, %6, %5 : vector<8x16xi32>
    %8 = arith.extui %7 : vector<8x16xi1> to vector<8x16xi32>
    %9 = arith.sitofp %8 : vector<8x16xi32> to vector<8x16xf32>
    %c0_4 = arith.constant 0 : index
    %c0_5 = arith.constant 0 : index
    %c0_6 = arith.constant 0 : index
    %10 = vector.load %arg4[%c0_4, %c0_5, %c0_6] : memref<1x8x32xf32, #tpu.memory_space<vmem>>, vector<1x8x32xf32>
    %11 = vector.shape_cast %10 : vector<1x8x32xf32> to vector<8x32xf32>
    %cst = arith.constant dense<0.000000e+00> : vector<8x32xf32>
    %12 = tpu.matmul %9, %3, %cst {dimension_numbers = #tpu.dot_dimension_numbers<[1], [0], [0], [1], [0, 0, 1, 1], [], []>} : vector<8x16xf32>, vector<16x32xf32>, vector<8x32xf32> -> vector<8x32xf32>
    %13 = arith.addf %11, %12 : vector<8x32xf32>
    %c0_7 = arith.constant 0 : index
    %c0_8 = arith.constant 0 : index
    %c0_9 = arith.constant 0 : index
    %14 = vector.load %arg4[%c0_7, %c0_8, %c0_9] : memref<1x8x32xf32, #tpu.memory_space<vmem>>, vector<1x8x32xf32>
    %15 = vector.shape_cast %14 : vector<1x8x32xf32> to vector<8x32xf32>
    %16 = vector.shape_cast %13 : vector<8x32xf32> to vector<1x8x32xf32>
    tpu.vector_store %arg4[%c0_7, %c0_8, %c0_9], %16 {strides = array<i32>} : memref<1x8x32xf32, #tpu.memory_space<vmem>>, vector<1x8x32xf32>,
    return
  }
  func.func @transform_0(%arg0: i32, %arg1: i32) -> (i32, i32) {
    %c1_i32 = arith.constant 1 : i32
    %0 = arith.muli %arg0, %c1_i32 : i32
    %1 = arith.addi %0, %arg1 : i32
    %c0_i32 = arith.constant 0 : i32
    %c0_i32_0 = arith.constant 0 : i32
    return %c0_i32, %1 : i32, i32
  }
  func.func @transform_1(%arg0: i32, %arg1: i32) -> (i32, i32) {
    %c1_i32 = arith.constant 1 : i32
    %0 = arith.muli %arg0, %c1_i32 : i32
    %1 = arith.addi %0, %arg1 : i32
    %c0_i32 = arith.constant 0 : i32
    %c0_i32_0 = arith.constant 0 : i32
    return %1, %c0_i32 : i32, i32
  }
  func.func @transform_2(%arg0: i32, %arg1: i32) -> (i32, i32, i32) {
    %c0_i32 = arith.constant 0 : i32
    %c0_i32_0 = arith.constant 0 : i32
    %c0_i32_1 = arith.constant 0 : i32
    return %arg0, %c0_i32, %c0_i32_0 : i32, i32, i32
  }
}

</mosaic_0001>

<bundles_post_ra>
// kernel: tpu_custom_call.1
= control target key start
LH: loop header
LB: loop body
LE: loop exit
PB: predicated region body
PF: predicated region fallthrough
CT: control target
= control target key end

     0   :  { %7 = vsyncpa [#allocation3], 0  ;;  %s231_s0 = inlined_call_operand.hbm [shape: s32[1,16], index: 0, kind: input, shape index: {}]   ;;  %s232_s1 = inlined_call_operand.hbm [shape: f32[16,32], index: 1, kind: input, shape index: {}]   ;;  %s233_s2 = inlined_call_operand.hbm [shape: f32[1,8,32], index: 2, kind: output, shape index: {}]  }
   0x1   :  { %8 = vsyncpa [#allocation6], 0 }
   0x2   :  { %9 = vsyncpa [#allocation4], 0  ;;  %s17_s11 = sshll.u32 %s231_s0, 4  ;;  %s199_s12 = smov [#allocation2]   ;;  %s18_s11 = int_to_ptr.hbm [resolvable:$true] %s17_s11 }
   0x3   :  { %s19_s13 = sshll.u32 %s199_s12, 4  ;;  %s31_s16 = sshll.u32 %s232_s1, 4  ;;  %s20_s13 = int_to_ptr.vmem [resolvable:$true] %s19_s13  ;;  %s32_s16 = int_to_ptr.hbm [resolvable:$true] %s31_s16 }
   0x4   :  { %22 = dma.hbm_to_vmem [thread:$0]  %s18_s11, 16, %s20_s13, [#allocation3]  }
   0x5   :  { %s200_s17 = smov [#allocation5]   ;;  %s201_s19 = smov 128  }
   0x6   :  { %s33_s18 = sshll.u32 %s200_s17, 4  ;;  %s202_s20 = smov 8   ;;  %s34_s18 = int_to_ptr.vmem [resolvable:$true] %s33_s18 }
   0x7   :  { %39 = dma.hbm_to_vmem [thread:$0]  %s32_s16, 256, %s34_s18, [#allocation6], %s201_s19, %s201_s19, %s202_s20  }
   0x8   :  { %193 = dma.done.wait [#allocation3], 16  }
   0x9   :  { %194 = vsyncadd [#allocation3], 4294967280 }
   0xa   :  { %195 = dma.done.wait [#allocation6], 256  }
   0xb   :  { %196 = vsyncadd [#allocation6], 4294967040  ;;  %vm55_vm0 = vcmask 261120   ;;  %v203_v0 = vmov 0.0   ;;  %v60_v1 = vlaneseq  ;;  %v58_v3 = vld [vmem:[#allocation5 + $0x8] sm:$0xff]  ;;  %v57_v4 = vld [vmem:[#allocation5] sm:$0xff] }
   0xc   :  { %56 = vst.msk [vmem:[#allocation7] sm:$0xff] %vm55_vm0, %v203_v0  ;;  %85 = vmatpush.msra.mxu0 %v58_v3  ;;  %v120_v5 = vld [vmem:[#allocation2] ss:$0 sm:$0xff]  ;;  %vm67_vm1 = vcmask 130048   ;;  %s204_s0 = smov [#allocation7]   ;;  %s101_s23 = sshll.u32 %s233_s2, 4  ;;  %s102_s23 = int_to_ptr.hbm [resolvable:$true] %s101_s23 }
   0xd   :  { %v61_v2 = vshrl.u32 %v60_v1, 7  ;;  %s99_s1 = sshll.u32 %s204_s0, 4  ;;  %s100_s1 = int_to_ptr.vmem [resolvable:$true] %s99_s1 }
   0xe   :  { %86 = vmatpush.msra.mxu0 %v57_v4 }
   0xf   :  { %vm63_vm2 = vcmp.eq.s32.totalorder %v120_v5, %v61_v2 }
  0x10   :  { %v112_v6 = vsel %vm63_vm2, 1.0, %v203_v0 }
  0x11   :  { %113 = vmatmul.msk.f32.vlgmr.msra.gmra.mxu0 %vm67_vm1, %v112_v6 }
  0x13   :  { %v66_v7 = vld [vmem:[#allocation7] sm:$0xff] }
  0x8e   :  { %v88_v8 = vpop.f32.mrf.mxu0 }
  0x8f   :  { %v91_v9 = vadd.f32 %v88_v8, %v66_v7 }
  0x91   :  { %93 = vst.msk [vmem:[#allocation7] sm:$0xff] %vm55_vm0, %v91_v9 }
  0x92   :  { %104 = dma.vmem_to_hbm [thread:$0]  %s100_s1, 128, %s102_s23, [#allocation4]  }
  0x93   :  { %197 = dma.done.wait [#allocation4], 128  }
  0x94   :  { %198 = vsyncadd [#allocation4], 4294967168 }
  0x95   :  { %109 = vsyncpa [#allocation3], 1 }
  0x96   :  { %110 = vsyncpa [#allocation6], 1 }
  0x97   :  { %111 = vsyncpa [#allocation4], 1 }

</bundles_post_ra>
